<compile_context>
chip_gen: v6e
topology: v6e:2x2x1
jax: 0.10.0
libtpu: 0.0.40
codegen_flags: <defaults>
</compile_context>

<pallas_src>
import functools

import jax
import jax.numpy as jnp
from jax.experimental import pallas as pl
from jax.experimental.pallas import tpu as pltpu

_LANES = 128


def _round_up(x, m):
    return -(-x // m) * m


def _output_envelope_kernel(ae_ref, sigma_ref, pi_ref, shift_ref, out_ref, *, n_dim, n_atoms):
    """One grid step over a dense slab of electrons.

    ae_ref    : [D*A, block_rows, 128] (VMEM)  channel-major: ae_ch[i*A + j] = ae[..., j, i]
    sigma_ref : [D*D*A] f32 (SMEM)             flattened sigma[i, j, k]
    pi_ref    : [A]     f32 (SMEM)
    shift_ref : [1]     f32 (SMEM)             c = log(sum_k exp(pi_k) + 1e-12)
    out_ref   : [1, 1, 128] f32 (VMEM)         lane-dense per-block partial sums of (log_env - c)
    """
    D, A = n_dim, n_atoms

    env = None
    for k in range(A):
        pi_k = pi_ref[k]                                    # SMEM scalar
        r2 = None
        for i in range(D):
            s = None
            for j in range(D):                              # contraction index (n_atoms == n_dim)
                sig = sigma_ref[(i * D + j) * A + k]        # SMEM scalar sigma[i, j, k]
                x = ae_ref[i * A + j].astype(jnp.float32)   # (block_rows, 128), loaded just-in-time
                term = sig * x
                s = term if s is None else s + term
            r2 = s * s if r2 is None else r2 + s * s
        e = jnp.exp(pi_k - jnp.sqrt(r2))                    # EUP sqrt + exp (matches ref: no LSE max-shift)
        env = e if env is None else env + e

    # Subtract the padded-entry constant c so all-zero padded rows/lanes contribute ~0 exactly;
    # the wrapper adds back N * c after the final reduction.
    shifted = jnp.log(env + 1e-12) - shift_ref[0]
    out_ref[...] = jnp.sum(shifted, axis=0, keepdims=True).reshape(1, 1, _LANES)


def output_envelope(ae, r_ae, r_ee, pi, sigma, *, block_rows=1024, stream_dtype=jnp.float32):
    """Wrapper matching OutputEnvelope.forward(ae, r_ae, r_ee) -> scalar."""
    del r_ae, r_ee  # accepted for signature parity; unused by the reference forward
    B, E, A, D = ae.shape
    assert sigma.shape == (D, D, A)
    assert pi.size == A
    assert A == D, "reference einsum 'ijk,mnij->mnik' requires n_atoms == n_dim"

    N = B * E
    itemsize = jnp.dtype(stream_dtype).itemsize
    sub = {4: 8, 2: 16, 1: 32}.get(itemsize, 8)             # sublane granularity for the stream dtype

    n_rows = -(-N // _LANES)                                 # rows of 128 lanes
    block_rows = max(sub, (block_rows // sub) * sub)
    br = min(block_rows, _round_up(n_rows, sub))
    # v7x megacore: prefer >= 2 grid steps when there is enough work for two blocks.
    if _round_up(n_rows, sub) > sub and -(-n_rows // br) < 2:
        br = _round_up(-(-n_rows // 2), sub)
    n_rows_pad = _round_up(n_rows, br)
    num_blocks = n_rows_pad // br
    n_streamed = n_rows_pad * _LANES

    # Channel-major lane-dense slab: ae_ch[i*A + j, n] = ae[b, e, j, i], n = b*E + e.
    # Cast to the streaming dtype BEFORE the layout pass so the (for now unavoidable) transpose
    # streams the narrow dtype; padding (zeros — required invariant) only when actually needed.
    ae_ch = jnp.transpose(ae.astype(stream_dtype), (3, 2, 0, 1)).reshape(D * A, N)
    if n_streamed != N:
        ae_ch = jnp.pad(ae_ch, ((0, 0), (0, n_streamed - N)))
    ae_ch3 = ae_ch.reshape(D * A, n_rows_pad, _LANES)

    sigma_flat = sigma.astype(jnp.float32).reshape(-1)       # [D*D*A] -> SMEM
    pi_flat = pi.astype(jnp.float32).reshape(-1)              # [A]     -> SMEM
    # Per-padded-entry constant (all-zero padding => r_ae_sigma == 0 for every atom).
    shift = jnp.log(jnp.sum(jnp.exp(pi_flat)) + 1e-12)        # scalar f32
    shift_arr = jnp.reshape(shift, (1,))                      # [1]     -> SMEM

    kernel = functools.partial(_output_envelope_kernel, n_dim=D, n_atoms=A)

    cost = pl.CostEstimate(
        flops=(2 * D * D * A + 2 * D * A + 2 * A + 2) * n_streamed,
        transcendentals=(2 * A + 1) * n_streamed,             # A sqrt + A exp + 1 log per element
        bytes_accessed=itemsize * D * A * n_streamed + 4 * _LANES * num_blocks
                       + 4 * (D * D * A + A + 1),
    )

    partials = pl.pallas_call(
        kernel,
        out_shape=jax.ShapeDtypeStruct((num_blocks, 1, _LANES), jnp.float32),
        grid=(num_blocks,),
        in_specs=[
            pl.BlockSpec((D * A, br, _LANES), lambda b: (0, b, 0)),   # streamed ae slab (VMEM)
            pl.BlockSpec(memory_space=pltpu.MemorySpace.SMEM),        # sigma scalars
            pl.BlockSpec(memory_space=pltpu.MemorySpace.SMEM),        # pi scalars
            pl.BlockSpec(memory_space=pltpu.MemorySpace.SMEM),        # padded-entry shift constant
        ],
        out_specs=pl.BlockSpec((1, 1, _LANES), lambda b: (b, 0, 0)),
        compiler_params=pltpu.CompilerParams(
            dimension_semantics=("parallel",),
            vmem_limit_bytes=32 * 1024 * 1024,
        ),
        cost_estimate=cost,
    )(ae_ch3, sigma_flat, pi_flat, shift_arr)

    # Padded entries contributed ~0 (they equal the shift exactly); add back N * shift for the
    # valid entries.  Final tiny reduction over lane-dense per-block partials is done in XLA.
    return jnp.sum(partials) + N * shift


def output_envelope_ref(ae, pi, sigma):
    """Pure-JAX reference mirroring the PyTorch code exactly."""
    ae_t = jnp.transpose(ae, (0, 1, 3, 2))
    ae_sigma = jnp.einsum('ijk,mnij->mnik', sigma, ae_t)
    r_ae_sigma = jnp.linalg.norm(ae_sigma, axis=2)
    return jnp.sum(jnp.log(jnp.sum(jnp.exp(-r_ae_sigma + pi), axis=2) + 1e-12))


if __name__ == "__main__":
    # Small shapes consistent with the module: batch=2, n_electrons=8, n_atoms=3, n_dim=3.
    batch, n_electrons, n_atoms, n_dim = 2, 8, 3, 3

    key = jax.random.PRNGKey(0)
    k_ae, k_ree = jax.random.split(key)
    ae = jax.random.normal(k_ae, (batch, n_electrons, n_atoms, n_dim), dtype=jnp.float32)
    r_ae = jnp.linalg.norm(ae, axis=-1, keepdims=True)                      # [B, E, A, 1]
    r_ee = jnp.abs(jax.random.normal(k_ree, (batch, n_electrons, n_electrons, 1),
                                     dtype=jnp.float32))                    # [B, E, E, 1]

    # Deterministic parameter init matching OutputEnvelope.__init__:
    #   pi = ones(n_atoms); sigma = eye(n_dim) broadcast over atoms -> [n_dim, n_dim, n_atoms]
    pi = jnp.ones((n_atoms,), dtype=jnp.float32)
    sigma = jnp.broadcast_to(jnp.eye(n_dim, dtype=jnp.float32)[:, :, None],
                             (n_dim, n_dim, n_atoms))

    out = output_envelope(ae, r_ae, r_ee, pi, sigma)
    out = jax.block_until_ready(out)

    expected = output_envelope_ref(ae, pi, sigma)
    assert jnp.allclose(out, expected, rtol=1e-4, atol=2e-4), (out, expected)

    print("KERNEL_OK")
</pallas_src>

<mosaic_0001>
module attributes {stable_mosaic.version = 11 : i64} {
  func.func @_output_envelope_kernel(%arg0: i32, %arg1: memref<9x8x128xf32, #tpu.memory_space<vmem>>, %arg2: memref<27xf32, #tpu.memory_space<smem>>, %arg3: memref<3xf32, #tpu.memory_space<smem>>, %arg4: memref<1xf32, #tpu.memory_space<smem>>, %arg5: memref<1x1x128xf32, #tpu.memory_space<vmem>>) attributes {dimension_semantics = [#tpu.dimension_semantics<parallel>], iteration_bounds = array<i64: 1>, scalar_prefetch = 0 : i64, scratch_operands = 0 : i64, tpu.core_type = #tpu.core_type<tc>, window_params = [{transform_indices = @transform_0, window_bounds = array<i64: 9, 8, 128>}, {transform_indices = @transform_1, window_bounds = array<i64: 27>}, {transform_indices = @transform_2, window_bounds = array<i64: 3>}, {transform_indices = @transform_3, window_bounds = array<i64: 1>}, {transform_indices = @transform_4, window_bounds = array<i64: 1, 1, 128>}]} {
    %c0 = arith.constant 0 : index
    %0 = memref.load %arg3[%c0] : memref<3xf32, #tpu.memory_space<smem>>
    %c0_0 = arith.constant 0 : index
    %1 = memref.load %arg2[%c0_0] : memref<27xf32, #tpu.memory_space<smem>>
    %c0_1 = arith.constant 0 : index
    %c0_2 = arith.constant 0 : index
    %c0_3 = arith.constant 0 : index
    %2 = vector.load %arg1[%c0_1, %c0_2, %c0_3] : memref<9x8x128xf32, #tpu.memory_space<vmem>>, vector<1x8x128xf32>
    %3 = vector.shape_cast %2 : vector<1x8x128xf32> to vector<8x128xf32>
    %4 = vector.broadcast %1 : f32 to vector<8x128xf32>
    %5 = arith.mulf %4, %3 : vector<8x128xf32>
    %c3 = arith.constant 3 : index
    %6 = memref.load %arg2[%c3] : memref<27xf32, #tpu.memory_space<smem>>
    %c1 = arith.constant 1 : index
    %c0_4 = arith.constant 0 : index
    %c0_5 = arith.constant 0 : index
    %7 = vector.load %arg1[%c1, %c0_4, %c0_5] : memref<9x8x128xf32, #tpu.memory_space<vmem>>, vector<1x8x128xf32>
    %8 = vector.shape_cast %7 : vector<1x8x128xf32> to vector<8x128xf32>
    %9 = vector.broadcast %6 : f32 to vector<8x128xf32>
    %10 = arith.mulf %9, %8 : vector<8x128xf32>
    %11 = arith.addf %5, %10 : vector<8x128xf32>
    %c6 = arith.constant 6 : index
    %12 = memref.load %arg2[%c6] : memref<27xf32, #tpu.memory_space<smem>>
    %c2 = arith.constant 2 : index
    %c0_6 = arith.constant 0 : index
    %c0_7 = arith.constant 0 : index
    %13 = vector.load %arg1[%c2, %c0_6, %c0_7] : memref<9x8x128xf32, #tpu.memory_space<vmem>>, vector<1x8x128xf32>
    %14 = vector.shape_cast %13 : vector<1x8x128xf32> to vector<8x128xf32>
    %15 = vector.broadcast %12 : f32 to vector<8x128xf32>
    %16 = arith.mulf %15, %14 : vector<8x128xf32>
    %17 = arith.addf %11, %16 : vector<8x128xf32>
    %18 = arith.mulf %17, %17 : vector<8x128xf32>
    %c9 = arith.constant 9 : index
    %19 = memref.load %arg2[%c9] : memref<27xf32, #tpu.memory_space<smem>>
    %c3_8 = arith.constant 3 : index
    %c0_9 = arith.constant 0 : index
    %c0_10 = arith.constant 0 : index
    %20 = vector.load %arg1[%c3_8, %c0_9, %c0_10] : memref<9x8x128xf32, #tpu.memory_space<vmem>>, vector<1x8x128xf32>
    %21 = vector.shape_cast %20 : vector<1x8x128xf32> to vector<8x128xf32>
    %22 = vector.broadcast %19 : f32 to vector<8x128xf32>
    %23 = arith.mulf %22, %21 : vector<8x128xf32>
    %c12 = arith.constant 12 : index
    %24 = memref.load %arg2[%c12] : memref<27xf32, #tpu.memory_space<smem>>
    %c4 = arith.constant 4 : index
    %c0_11 = arith.constant 0 : index
    %c0_12 = arith.constant 0 : index
    %25 = vector.load %arg1[%c4, %c0_11, %c0_12] : memref<9x8x128xf32, #tpu.memory_space<vmem>>, vector<1x8x128xf32>
    %26 = vector.shape_cast %25 : vector<1x8x128xf32> to vector<8x128xf32>
    %27 = vector.broadcast %24 : f32 to vector<8x128xf32>
    %28 = arith.mulf %27, %26 : vector<8x128xf32>
    %29 = arith.addf %23, %28 : vector<8x128xf32>
    %c15 = arith.constant 15 : index
    %30 = memref.load %arg2[%c15] : memref<27xf32, #tpu.memory_space<smem>>
    %c5 = arith.constant 5 : index
    %c0_13 = arith.constant 0 : index
    %c0_14 = arith.constant 0 : index
    %31 = vector.load %arg1[%c5, %c0_13, %c0_14] : memref<9x8x128xf32, #tpu.memory_space<vmem>>, vector<1x8x128xf32>
    %32 = vector.shape_cast %31 : vector<1x8x128xf32> to vector<8x128xf32>
    %33 = vector.broadcast %30 : f32 to vector<8x128xf32>
    %34 = arith.mulf %33, %32 : vector<8x128xf32>
    %35 = arith.addf %29, %34 : vector<8x128xf32>
    %36 = arith.mulf %35, %35 : vector<8x128xf32>
    %37 = arith.addf %18, %36 : vector<8x128xf32>
    %c18 = arith.constant 18 : index
    %38 = memref.load %arg2[%c18] : memref<27xf32, #tpu.memory_space<smem>>
    %c6_15 = arith.constant 6 : index
    %c0_16 = arith.constant 0 : index
    %c0_17 = arith.constant 0 : index
    %39 = vector.load %arg1[%c6_15, %c0_16, %c0_17] : memref<9x8x128xf32, #tpu.memory_space<vmem>>, vector<1x8x128xf32>
    %40 = vector.shape_cast %39 : vector<1x8x128xf32> to vector<8x128xf32>
    %41 = vector.broadcast %38 : f32 to vector<8x128xf32>
    %42 = arith.mulf %41, %40 : vector<8x128xf32>
    %c21 = arith.constant 21 : index
    %43 = memref.load %arg2[%c21] : memref<27xf32, #tpu.memory_space<smem>>
    %c7 = arith.constant 7 : index
    %c0_18 = arith.constant 0 : index
    %c0_19 = arith.constant 0 : index
    %44 = vector.load %arg1[%c7, %c0_18, %c0_19] : memref<9x8x128xf32, #tpu.memory_space<vmem>>, vector<1x8x128xf32>
    %45 = vector.shape_cast %44 : vector<1x8x128xf32> to vector<8x128xf32>
    %46 = vector.broadcast %43 : f32 to vector<8x128xf32>
    %47 = arith.mulf %46, %45 : vector<8x128xf32>
    %48 = arith.addf %42, %47 : vector<8x128xf32>
    %c24 = arith.constant 24 : index
    %49 = memref.load %arg2[%c24] : memref<27xf32, #tpu.memory_space<smem>>
    %c8 = arith.constant 8 : index
    %c0_20 = arith.constant 0 : index
    %c0_21 = arith.constant 0 : index
    %50 = vector.load %arg1[%c8, %c0_20, %c0_21] : memref<9x8x128xf32, #tpu.memory_space<vmem>>, vector<1x8x128xf32>
    %51 = vector.shape_cast %50 : vector<1x8x128xf32> to vector<8x128xf32>
    %52 = vector.broadcast %49 : f32 to vector<8x128xf32>
    %53 = arith.mulf %52, %51 : vector<8x128xf32>
    %54 = arith.addf %48, %53 : vector<8x128xf32>
    %55 = arith.mulf %54, %54 : vector<8x128xf32>
    %56 = arith.addf %37, %55 : vector<8x128xf32>
    %57 = math.sqrt %56 : vector<8x128xf32>
    %58 = vector.broadcast %0 : f32 to vector<8x128xf32>
    %59 = arith.subf %58, %57 : vector<8x128xf32>
    %60 = math.exp %59 : vector<8x128xf32>
    %c1_22 = arith.constant 1 : index
    %61 = memref.load %arg3[%c1_22] : memref<3xf32, #tpu.memory_space<smem>>
    %c1_23 = arith.constant 1 : index
    %62 = memref.load %arg2[%c1_23] : memref<27xf32, #tpu.memory_space<smem>>
    %c0_24 = arith.constant 0 : index
    %c0_25 = arith.constant 0 : index
    %c0_26 = arith.constant 0 : index
    %63 = vector.load %arg1[%c0_24, %c0_25, %c0_26] : memref<9x8x128xf32, #tpu.memory_space<vmem>>, vector<1x8x128xf32>
    %64 = vector.shape_cast %63 : vector<1x8x128xf32> to vector<8x128xf32>
    %65 = vector.broadcast %62 : f32 to vector<8x128xf32>
    %66 = arith.mulf %65, %64 : vector<8x128xf32>
    %c4_27 = arith.constant 4 : index
    %67 = memref.load %arg2[%c4_27] : memref<27xf32, #tpu.memory_space<smem>>
    %c1_28 = arith.constant 1 : index
    %c0_29 = arith.constant 0 : index
    %c0_30 = arith.constant 0 : index
    %68 = vector.load %arg1[%c1_28, %c0_29, %c0_30] : memref<9x8x128xf32, #tpu.memory_space<vmem>>, vector<1x8x128xf32>
    %69 = vector.shape_cast %68 : vector<1x8x128xf32> to vector<8x128xf32>
    %70 = vector.broadcast %67 : f32 to vector<8x128xf32>
    %71 = arith.mulf %70, %69 : vector<8x128xf32>
    %72 = arith.addf %66, %71 : vector<8x128xf32>
    %c7_31 = arith.constant 7 : index
    %73 = memref.load %arg2[%c7_31] : memref<27xf32, #tpu.memory_space<smem>>
    %c2_32 = arith.constant 2 : index
    %c0_33 = arith.constant 0 : index
    %c0_34 = arith.constant 0 : index
    %74 = vector.load %arg1[%c2_32, %c0_33, %c0_34] : memref<9x8x128xf32, #tpu.memory_space<vmem>>, vector<1x8x128xf32>
    %75 = vector.shape_cast %74 : vector<1x8x128xf32> to vector<8x128xf32>
    %76 = vector.broadcast %73 : f32 to vector<8x128xf32>
    %77 = arith.mulf %76, %75 : vector<8x128xf32>
    %78 = arith.addf %72, %77 : vector<8x128xf32>
    %79 = arith.mulf %78, %78 : vector<8x128xf32>
    %c10 = arith.constant 10 : index
    %80 = memref.load %arg2[%c10] : memref<27xf32, #tpu.memory_space<smem>>
    %c3_35 = arith.constant 3 : index
    %c0_36 = arith.constant 0 : index
    %c0_37 = arith.constant 0 : index
    %81 = vector.load %arg1[%c3_35, %c0_36, %c0_37] : memref<9x8x128xf32, #tpu.memory_space<vmem>>, vector<1x8x128xf32>
    %82 = vector.shape_cast %81 : vector<1x8x128xf32> to vector<8x128xf32>
    %83 = vector.broadcast %80 : f32 to vector<8x128xf32>
    %84 = arith.mulf %83, %82 : vector<8x128xf32>
    %c13 = arith.constant 13 : index
    %85 = memref.load %arg2[%c13] : memref<27xf32, #tpu.memory_space<smem>>
    %c4_38 = arith.constant 4 : index
    %c0_39 = arith.constant 0 : index
    %c0_40 = arith.constant 0 : index
    %86 = vector.load %arg1[%c4_38, %c0_39, %c0_40] : memref<9x8x128xf32, #tpu.memory_space<vmem>>, vector<1x8x128xf32>
    %87 = vector.shape_cast %86 : vector<1x8x128xf32> to vector<8x128xf32>
    %88 = vector.broadcast %85 : f32 to vector<8x128xf32>
    %89 = arith.mulf %88, %87 : vector<8x128xf32>
    %90 = arith.addf %84, %89 : vector<8x128xf32>
    %c16 = arith.constant 16 : index
    %91 = memref.load %arg2[%c16] : memref<27xf32, #tpu.memory_space<smem>>
    %c5_41 = arith.constant 5 : index
    %c0_42 = arith.constant 0 : index
    %c0_43 = arith.constant 0 : index
    %92 = vector.load %arg1[%c5_41, %c0_42, %c0_43] : memref<9x8x128xf32, #tpu.memory_space<vmem>>, vector<1x8x128xf32>
    %93 = vector.shape_cast %92 : vector<1x8x128xf32> to vector<8x128xf32>
    %94 = vector.broadcast %91 : f32 to vector<8x128xf32>
    %95 = arith.mulf %94, %93 : vector<8x128xf32>
    %96 = arith.addf %90, %95 : vector<8x128xf32>
    %97 = arith.mulf %96, %96 : vector<8x128xf32>
    %98 = arith.addf %79, %97 : vector<8x128xf32>
    %c19 = arith.constant 19 : index
    %99 = memref.load %arg2[%c19] : memref<27xf32, #tpu.memory_space<smem>>
    %c6_44 = arith.constant 6 : index
    %c0_45 = arith.constant 0 : index
    %c0_46 = arith.constant 0 : index
    %100 = vector.load %arg1[%c6_44, %c0_45, %c0_46] : memref<9x8x128xf32, #tpu.memory_space<vmem>>, vector<1x8x128xf32>
    %101 = vector.shape_cast %100 : vector<1x8x128xf32> to vector<8x128xf32>
    %102 = vector.broadcast %99 : f32 to vector<8x128xf32>
    %103 = arith.mulf %102, %101 : vector<8x128xf32>
    %c22 = arith.constant 22 : index
    %104 = memref.load %arg2[%c22] : memref<27xf32, #tpu.memory_space<smem>>
    %c7_47 = arith.constant 7 : index
    %c0_48 = arith.constant 0 : index
    %c0_49 = arith.constant 0 : index
    %105 = vector.load %arg1[%c7_47, %c0_48, %c0_49] : memref<9x8x128xf32, #tpu.memory_space<vmem>>, vector<1x8x128xf32>
    %106 = vector.shape_cast %105 : vector<1x8x128xf32> to vector<8x128xf32>
    %107 = vector.broadcast %104 : f32 to vector<8x128xf32>
    %108 = arith.mulf %107, %106 : vector<8x128xf32>
    %109 = arith.addf %103, %108 : vector<8x128xf32>
    %c25 = arith.constant 25 : index
    %110 = memref.load %arg2[%c25] : memref<27xf32, #tpu.memory_space<smem>>
    %c8_50 = arith.constant 8 : index
    %c0_51 = arith.constant 0 : index
    %c0_52 = arith.constant 0 : index
    %111 = vector.load %arg1[%c8_50, %c0_51, %c0_52] : memref<9x8x128xf32, #tpu.memory_space<vmem>>, vector<1x8x128xf32>
    %112 = vector.shape_cast %111 : vector<1x8x128xf32> to vector<8x128xf32>
    %113 = vector.broadcast %110 : f32 to vector<8x128xf32>
    %114 = arith.mulf %113, %112 : vector<8x128xf32>
    %115 = arith.addf %109, %114 : vector<8x128xf32>
    %116 = arith.mulf %115, %115 : vector<8x128xf32>
    %117 = arith.addf %98, %116 : vector<8x128xf32>
    %118 = math.sqrt %117 : vector<8x128xf32>
    %119 = vector.broadcast %61 : f32 to vector<8x128xf32>
    %120 = arith.subf %119, %118 : vector<8x128xf32>
    %121 = math.exp %120 : vector<8x128xf32>
    %122 = arith.addf %60, %121 : vector<8x128xf32>
    %c2_53 = arith.constant 2 : index
    %123 = memref.load %arg3[%c2_53] : memref<3xf32, #tpu.memory_space<smem>>
    %c2_54 = arith.constant 2 : index
    %124 = memref.load %arg2[%c2_54] : memref<27xf32, #tpu.memory_space<smem>>
    %c0_55 = arith.constant 0 : index
    %c0_56 = arith.constant 0 : index
    %c0_57 = arith.constant 0 : index
    %125 = vector.load %arg1[%c0_55, %c0_56, %c0_57] : memref<9x8x128xf32, #tpu.memory_space<vmem>>, vector<1x8x128xf32>
    %126 = vector.shape_cast %125 : vector<1x8x128xf32> to vector<8x128xf32>
    %127 = vector.broadcast %124 : f32 to vector<8x128xf32>
    %128 = arith.mulf %127, %126 : vector<8x128xf32>
    %c5_58 = arith.constant 5 : index
    %129 = memref.load %arg2[%c5_58] : memref<27xf32, #tpu.memory_space<smem>>
    %c1_59 = arith.constant 1 : index
    %c0_60 = arith.constant 0 : index
    %c0_61 = arith.constant 0 : index
    %130 = vector.load %arg1[%c1_59, %c0_60, %c0_61] : memref<9x8x128xf32, #tpu.memory_space<vmem>>, vector<1x8x128xf32>
    %131 = vector.shape_cast %130 : vector<1x8x128xf32> to vector<8x128xf32>
    %132 = vector.broadcast %129 : f32 to vector<8x128xf32>
    %133 = arith.mulf %132, %131 : vector<8x128xf32>
    %134 = arith.addf %128, %133 : vector<8x128xf32>
    %c8_62 = arith.constant 8 : index
    %135 = memref.load %arg2[%c8_62] : memref<27xf32, #tpu.memory_space<smem>>
    %c2_63 = arith.constant 2 : index
    %c0_64 = arith.constant 0 : index
    %c0_65 = arith.constant 0 : index
    %136 = vector.load %arg1[%c2_63, %c0_64, %c0_65] : memref<9x8x128xf32, #tpu.memory_space<vmem>>, vector<1x8x128xf32>
    %137 = vector.shape_cast %136 : vector<1x8x128xf32> to vector<8x128xf32>
    %138 = vector.broadcast %135 : f32 to vector<8x128xf32>
    %139 = arith.mulf %138, %137 : vector<8x128xf32>
    %140 = arith.addf %134, %139 : vector<8x128xf32>
    %141 = arith.mulf %140, %140 : vector<8x128xf32>
    %c11 = arith.constant 11 : index
    %142 = memref.load %arg2[%c11] : memref<27xf32, #tpu.memory_space<smem>>
    %c3_66 = arith.constant 3 : index
    %c0_67 = arith.constant 0 : index
    %c0_68 = arith.constant 0 : index
    %143 = vector.load %arg1[%c3_66, %c0_67, %c0_68] : memref<9x8x128xf32, #tpu.memory_space<vmem>>, vector<1x8x128xf32>
    %144 = vector.shape_cast %143 : vector<1x8x128xf32> to vector<8x128xf32>
    %145 = vector.broadcast %142 : f32 to vector<8x128xf32>
    %146 = arith.mulf %145, %144 : vector<8x128xf32>
    %c14 = arith.constant 14 : index
    %147 = memref.load %arg2[%c14] : memref<27xf32, #tpu.memory_space<smem>>
    %c4_69 = arith.constant 4 : index
    %c0_70 = arith.constant 0 : index
    %c0_71 = arith.constant 0 : index
    %148 = vector.load %arg1[%c4_69, %c0_70, %c0_71] : memref<9x8x128xf32, #tpu.memory_space<vmem>>, vector<1x8x128xf32>
    %149 = vector.shape_cast %148 : vector<1x8x128xf32> to vector<8x128xf32>
    %150 = vector.broadcast %147 : f32 to vector<8x128xf32>
    %151 = arith.mulf %150, %149 : vector<8x128xf32>
    %152 = arith.addf %146, %151 : vector<8x128xf32>
    %c17 = arith.constant 17 : index
    %153 = memref.load %arg2[%c17] : memref<27xf32, #tpu.memory_space<smem>>
    %c5_72 = arith.constant 5 : index
    %c0_73 = arith.constant 0 : index
    %c0_74 = arith.constant 0 : index
    %154 = vector.load %arg1[%c5_72, %c0_73, %c0_74] : memref<9x8x128xf32, #tpu.memory_space<vmem>>, vector<1x8x128xf32>
    %155 = vector.shape_cast %154 : vector<1x8x128xf32> to vector<8x128xf32>
    %156 = vector.broadcast %153 : f32 to vector<8x128xf32>
    %157 = arith.mulf %156, %155 : vector<8x128xf32>
    %158 = arith.addf %152, %157 : vector<8x128xf32>
    %159 = arith.mulf %158, %158 : vector<8x128xf32>
    %160 = arith.addf %141, %159 : vector<8x128xf32>
    %c20 = arith.constant 20 : index
    %161 = memref.load %arg2[%c20] : memref<27xf32, #tpu.memory_space<smem>>
    %c6_75 = arith.constant 6 : index
    %c0_76 = arith.constant 0 : index
    %c0_77 = arith.constant 0 : index
    %162 = vector.load %arg1[%c6_75, %c0_76, %c0_77] : memref<9x8x128xf32, #tpu.memory_space<vmem>>, vector<1x8x128xf32>
    %163 = vector.shape_cast %162 : vector<1x8x128xf32> to vector<8x128xf32>
    %164 = vector.broadcast %161 : f32 to vector<8x128xf32>
    %165 = arith.mulf %164, %163 : vector<8x128xf32>
    %c23 = arith.constant 23 : index
    %166 = memref.load %arg2[%c23] : memref<27xf32, #tpu.memory_space<smem>>
    %c7_78 = arith.constant 7 : index
    %c0_79 = arith.constant 0 : index
    %c0_80 = arith.constant 0 : index
    %167 = vector.load %arg1[%c7_78, %c0_79, %c0_80] : memref<9x8x128xf32, #tpu.memory_space<vmem>>, vector<1x8x128xf32>
    %168 = vector.shape_cast %167 : vector<1x8x128xf32> to vector<8x128xf32>
    %169 = vector.broadcast %166 : f32 to vector<8x128xf32>
    %170 = arith.mulf %169, %168 : vector<8x128xf32>
    %171 = arith.addf %165, %170 : vector<8x128xf32>
    %c26 = arith.constant 26 : index
    %172 = memref.load %arg2[%c26] : memref<27xf32, #tpu.memory_space<smem>>
    %c8_81 = arith.constant 8 : index
    %c0_82 = arith.constant 0 : index
    %c0_83 = arith.constant 0 : index
    %173 = vector.load %arg1[%c8_81, %c0_82, %c0_83] : memref<9x8x128xf32, #tpu.memory_space<vmem>>, vector<1x8x128xf32>
    %174 = vector.shape_cast %173 : vector<1x8x128xf32> to vector<8x128xf32>
    %175 = vector.broadcast %172 : f32 to vector<8x128xf32>
    %176 = arith.mulf %175, %174 : vector<8x128xf32>
    %177 = arith.addf %171, %176 : vector<8x128xf32>
    %178 = arith.mulf %177, %177 : vector<8x128xf32>
    %179 = arith.addf %160, %178 : vector<8x128xf32>
    %180 = math.sqrt %179 : vector<8x128xf32>
    %181 = vector.broadcast %123 : f32 to vector<8x128xf32>
    %182 = arith.subf %181, %180 : vector<8x128xf32>
    %183 = math.exp %182 : vector<8x128xf32>
    %184 = arith.addf %122, %183 : vector<8x128xf32>
    %cst = arith.constant 9.99999996E-13 : f32
    %185 = vector.broadcast %cst : f32 to vector<8x128xf32>
    %186 = arith.addf %184, %185 : vector<8x128xf32>
    %187 = math.log %186 : vector<8x128xf32>
    %c0_84 = arith.constant 0 : index
    %188 = memref.load %arg4[%c0_84] : memref<1xf32, #tpu.memory_space<smem>>
    %189 = vector.broadcast %188 : f32 to vector<8x128xf32>
    %190 = arith.subf %187, %189 : vector<8x128xf32>
    %cst_85 = arith.constant dense<0.000000e+00> : vector<128xf32>
    %191 = vector.multi_reduction <add>, %190, %cst_85 [0] : vector<8x128xf32> to vector<128xf32>
    %192 = vector.shape_cast %191 : vector<128xf32> to vector<1x128xf32>
    %193 = vector.shape_cast %192 : vector<1x128xf32> to vector<1x1x128xf32>
    %c0_86 = arith.constant 0 : index
    %c0_87 = arith.constant 0 : index
    %c0_88 = arith.constant 0 : index
    %194 = vector.load %arg5[%c0_86, %c0_87, %c0_88] : memref<1x1x128xf32, #tpu.memory_space<vmem>>, vector<1x1x128xf32>
    tpu.vector_store %arg5[%c0_86, %c0_87, %c0_88], %193 {strides = array<i32>} : memref<1x1x128xf32, #tpu.memory_space<vmem>>, vector<1x1x128xf32>,
    return
  }
  func.func @transform_0(%arg0: i32) -> (i32, i32, i32) {
    %c0_i32 = arith.constant 0 : i32
    %c0_i32_0 = arith.constant 0 : i32
    %c0_i32_1 = arith.constant 0 : i32
    return %c0_i32, %arg0, %c0_i32_0 : i32, i32, i32
  }
  func.func @transform_1(%arg0: i32) -> i32 {
    %c0_i32 = arith.constant 0 : i32
    %c0_i32_0 = arith.constant 0 : i32
    return %c0_i32 : i32
  }
  func.func @transform_2(%arg0: i32) -> i32 {
    %c0_i32 = arith.constant 0 : i32
    %c0_i32_0 = arith.constant 0 : i32
    return %c0_i32 : i32
  }
  func.func @transform_3(%arg0: i32) -> i32 {
    %c0_i32 = arith.constant 0 : i32
    %c0_i32_0 = arith.constant 0 : i32
    return %c0_i32 : i32
  }
  func.func @transform_4(%arg0: i32) -> (i32, i32, i32) {
    %c0_i32 = arith.constant 0 : i32
    %c0_i32_0 = arith.constant 0 : i32
    %c0_i32_1 = arith.constant 0 : i32
    return %arg0, %c0_i32, %c0_i32_0 : i32, i32, i32
  }
}

</mosaic_0001>

<bundles_post_ra>
// kernel: tpu_custom_call.1
= control target key start
LH: loop header
LB: loop body
LE: loop exit
PB: predicated region body
PF: predicated region fallthrough
CT: control target
= control target key end

     0   :  { %10 = vsyncpa [#allocation4], 0  ;;  %s476_s0 = inlined_call_operand.hbm [shape: f32[9,8,128], index: 0, kind: input, shape index: {}]   ;;  %s477_s1 = inlined_call_operand.vmem [shape: f32[27], index: 1, kind: input, shape index: {}]   ;;  %s478_s2 = inlined_call_operand.vmem [shape: f32[3], index: 2, kind: input, shape index: {}]   ;;  %s479_s3 = inlined_call_operand.<no memory space> [shape: f32[1], index: 3, kind: input, shape index: {}]   ;;  %s480_s4 = inlined_call_operand.hbm [shape: f32[1,1,128], index: 4, kind: output, shape index: {}]  }
   0x1   :  { %11 = vsyncpa [#allocation6], 0 }
   0x2   :  { %12 = vsyncpa [#allocation9], 0 }
   0x3   :  { %13 = vsyncpa [#allocation5], 0  ;;  %s377_s15 = smov [#allocation3]   ;;  %s32_s19 = sshll.u32 %s477_s1, 4  ;;  %s33_s19 = int_to_ptr.vmem [resolvable:$true] %s32_s19 }
   0x4   :  { %s19_s16 = sshll.u32 %s377_s15, 4  ;;  %s20_s16 = int_to_ptr.vmem [resolvable:$true] %s19_s16 }
   0x5   :  { %s313_s20 = scalar_lea.vmem %s20_s16, 1152  ;;  %p318_p1 = scmp.lt.s32.totalorder %s20_s16, %s20_s16 }
   0x6   :  { %p314_p0 = scmp.ne.s32.totalorder %s20_s16, %s313_s20  ;;  %p319_p2 = scmp.lt.s32.totalorder %s313_s20, %s313_s20 }
   0x8   :  { %p320_p3 = por %p319_p2, %p318_p1 }
   0xa   :  { %p321_p4 = pnand %p320_p3, %p314_p0 }
   0xc   :  { %324 = shalt.err (!%p321_p4)
}
   0xd   :  { %s378_s21 = smov 128   ;;  %s379_s22 = smov 8  }
   0xe   :  { %25 = dma.hbm_to_vmem [thread:$0]  %s476_s0, 1152, %s20_s16, [#allocation4], %s378_s21, %s378_s21, %s379_s22  }
   0xf   :  { %s325_s25 = scalar_lea.vmem %s33_s19, 16  ;;  %p330_p6 = scmp.lt.s32.totalorder %s33_s19, %s33_s19 }
  0x10   :  { %p326_p5 = scmp.ne.s32.totalorder %s33_s19, %s325_s25  ;;  %p331_p7 = scmp.lt.s32.totalorder %s325_s25, %s325_s25 }
  0x12   :  { %p332_p8 = por %p331_p7, %p330_p6 }
  0x14   :  { %p333_p9 = pnand %p332_p8, %p326_p5 }
  0x16   :  { %336 = shalt.err (!%p333_p9)
}
  0x17   :  { %s380_s1 = smov [#allocation7]   ;;  %s42_s28 = sshll.u32 %s478_s2, 4  ;;  %s43_s28 = int_to_ptr.vmem [resolvable:$true] %s42_s28 }
  0x18   :  { %35 = dma.vmem_to_smem %s33_s19, 16, %s380_s1, [#allocation6]  }
  0x19   :  { %s337_s29 = scalar_lea.vmem %s43_s28, 16  ;;  %p342_p11 = scmp.lt.s32.totalorder %s43_s28, %s43_s28 }
  0x1a   :  { %p338_p10 = scmp.ne.s32.totalorder %s43_s28, %s337_s29  ;;  %p343_p12 = scmp.lt.s32.totalorder %s337_s29, %s337_s29 }
  0x1c   :  { %p344_p13 = por %p343_p12, %p342_p11 }
  0x1e   :  { %p345_p0 = pnand %p344_p13, %p338_p10 }
  0x20   :  { %348 = shalt.err (!%p345_p0)
}
  0x21   :  { %s381_s0 = smov [#allocation8]  }
  0x22   :  { %45 = dma.vmem_to_smem %s43_s28, 16, %s381_s0, [#allocation9]  }
  0x23   :  { %369 = dma.done.wait [#allocation4], 1152  }
  0x24   :  { %370 = vsyncadd [#allocation4], 4294966144 }
  0x25   :  { %371 = dma.done.wait [#allocation6], 16  }
  0x26   :  { %372 = vsyncadd [#allocation6], 4294967280 }
  0x27   :  { %373 = dma.done.wait [#allocation9], 16  }
  0x28   :  { %374 = vsyncadd [#allocation9], 4294967280 }
  0x29   :  { %57 = sfence }
  0x2a   :  { %s59_s30 = sld [smem:[#allocation7]]  ;;  %v417_v0 = vld [vmem:[#allocation3] sm:$0xff]  ;;  %v419_v1 = vld [vmem:[#allocation3 + $0x8] sm:$0xff]  ;;  %v421_v3 = vld [vmem:[#allocation3 + $0x10] sm:$0xff] }
  0x2b   :  { %s257_s5 = sld [smem:[#allocation7 + $0x3]]  ;;  %v424_v6 = vld [vmem:[#allocation3 + $0x18] sm:$0xff]  ;;  %v427_v9 = vld [vmem:[#allocation3 + $0x20] sm:$0xff]  ;;  %v430_v12 = vld [vmem:[#allocation3 + $0x28] sm:$0xff] }
  0x2c   :  { %s258_s2 = sld [smem:[#allocation7 + $0x6]]  ;;  %v433_v16 = vld [vmem:[#allocation3 + $0x30] sm:$0xff]  ;;  %v436_v19 = vld [vmem:[#allocation3 + $0x38] sm:$0xff]  ;;  %v439_v23 = vld [vmem:[#allocation3 + $0x40] sm:$0xff] }
  0x2d   :  { %s259_s6 = sld [smem:[#allocation7 + $0x9]] }
  0x2e   :  { %s260_s7 = sld [smem:[#allocation7 + $0xc]] }
  0x2f   :  { %s261_s8 = sld [smem:[#allocation7 + $0xf]] }
  0x30   :  { %v61_v2 = vstv %s59_s30  ;;  %s262_s9 = sld [smem:[#allocation7 + $0x12]] }
  0x31   :  { %v62_v4 = vmul.f32 %v61_v2, %v417_v0  ;;  %v66_v5 = vstv %s257_s5  ;;  %s263_s10 = sld [smem:[#allocation7 + $0x15]] }
  0x32   :  { %v67_v7 = vmul.f32 %v66_v5, %v419_v1  ;;  %v72_v8 = vstv %s258_s2  ;;  %s264_s11 = sld [smem:[#allocation7 + $0x18]] }
  0x33   :  { %v73_v10 = vmul.f32 %v72_v8, %v421_v3  ;;  %v79_v11 = vstv %s259_s6  ;;  %s266_s12 = sld [smem:[#allocation7 + $0x1]]  ;;  %s382_s6 = smov [#allocation10]  }
  0x34   :  { %v68_v13 = vadd.f32 %v67_v7, %v62_v4  ;;  %v80_v14 = vmul.f32 %v79_v11, %v424_v6  ;;  %v84_v15 = vstv %s260_s7  ;;  %s267_s13 = sld [smem:[#allocation7 + $0x4]]  ;;  %s246_s7 = sshll.u32 %s382_s6, 4  ;;  %s247_s7 = int_to_ptr.vmem [resolvable:$true] %s246_s7 }
  0x35   :  { %v85_v17 = vmul.f32 %v84_v15, %v427_v9  ;;  %v90_v18 = vstv %s261_s8  ;;  %s268_s14 = sld [smem:[#allocation7 + $0x7]]  ;;  %s349_s8 = scalar_lea.vmem %s247_s7, 16 }
  0x36   :  { %v74_v20 = vadd.f32 %v73_v10, %v68_v13  ;;  %v91_v21 = vmul.f32 %v90_v18, %v430_v12  ;;  %v98_v22 = vstv %s262_s9  ;;  %s269_s15 = sld [smem:[#allocation7 + $0xa]]  ;;  %p350_p1 = scmp.ne.s32.totalorder %s247_s7, %s349_s8 }
  0x37   :  { %v86_v24 = vadd.f32 %v85_v17, %v80_v14  ;;  %v99_v25 = vmul.f32 %v98_v22, %v433_v16  ;;  %v103_v26 = vstv %s263_s10  ;;  %s270_s16 = sld [smem:[#allocation7 + $0xd]]  ;;  %s353_s9 = scalar_lea.vmem %s247_s7, 32 }
  0x38   :  { %v104_v27 = vmul.f32 %v103_v26, %v436_v19  ;;  %v109_v28 = vstv %s264_s11  ;;  %v75_v29 = vmul.f32 %v74_v20, %v74_v20  ;;  %s271_s17 = sld [smem:[#allocation7 + $0x10]]  ;;  %p354_p2 = scmp.lt.s32.totalorder %s247_s7, %s247_s7 }
  0x39   :  { %v92_v30 = vadd.f32 %v91_v21, %v86_v24  ;;  %v110_v31 = vmul.f32 %v109_v28, %v439_v23  ;;  %v127_v33 = vstv %s266_s12  ;;  %s272_s18 = sld [smem:[#allocation7 + $0x13]]  ;;  %p355_p3 = scmp.lt.s32.totalorder %s353_s9, %s349_s8 }
  0x3a   :  { %v105_v32 = vadd.f32 %v104_v27, %v99_v25  ;;  %v128_v35 = vmul.f32 %v127_v33, %v417_v0  ;;  %v130_v36 = vstv %s267_s13  ;;  %s273_s19 = sld [smem:[#allocation7 + $0x16]] }
  0x3b   :  { %v93_v34 = vmul.f32 %v92_v30, %v92_v30  ;;  %v131_v38 = vmul.f32 %v130_v36, %v419_v1  ;;  %v134_v39 = vstv %s268_s14  ;;  %s274_s20 = sld [smem:[#allocation7 + $0x19]]  ;;  %p356_p4 = por %p355_p3, %p354_p2 }
  0x3c   :  { %v111_v37 = vadd.f32 %v110_v31, %v105_v32  ;;  %v135_v41 = vmul.f32 %v134_v39, %v421_v3  ;;  %v139_v42 = vstv %s269_s15  ;;  %s276_s21 = sld [smem:[#allocation7 + $0x2]] }
  0x3d   :  { %v94_v40 = vadd.f32 %v93_v34, %v75_v29  ;;  %v132_v44 = vadd.f32 %v131_v38, %v128_v35  ;;  %v140_v45 = vmul.f32 %v139_v42, %v424_v6  ;;  %v142_v46 = vstv %s270_s16  ;;  %s277_s22 = sld [smem:[#allocation7 + $0x5]]  ;;  %p357_p5 = pnand %p356_p4, %p350_p1 }
  0x3e   :  { %v112_v43 = vmul.f32 %v111_v37, %v111_v37  ;;  %v143_v47 = vmul.f32 %v142_v46, %v427_v9  ;;  %v146_v48 = vstv %s271_s17  ;;  %s278_s23 = sld [smem:[#allocation7 + $0x8]] }
  0x3f   :  { %v136_v50 = vadd.f32 %v135_v41, %v132_v44  ;;  %v147_v51 = vmul.f32 %v146_v48, %v430_v12  ;;  %v152_v52 = vstv %s272_s18  ;;  %s279_s24 = sld [smem:[#allocation7 + $0xb]] }
  0x40   :  { %v449_v49 = vadd.f32 %v112_v43, %v94_v40  ;;  %v144_v53 = vadd.f32 %v143_v47, %v140_v45  ;;  %v153_v54 = vmul.f32 %v152_v52, %v433_v16  ;;  %v155_v55 = vstv %s273_s19  ;;  %s280_s25 = sld [smem:[#allocation7 + $0xe]] }
  0x41   :  { %v137_v56 = vmul.f32 %v136_v50, %v136_v50  ;;  %v156_v58 = vmul.f32 %v155_v55, %v436_v19  ;;  %v159_v59 = vstv %s274_s20  ;;  %s281_s1 = sld [smem:[#allocation7 + $0x11]] }
  0x42   :  { %291 = vrsqrt.f32 %v449_v49  ;;  %v148_v57 = vadd.f32 %v147_v51, %v144_v53  ;;  %v160_v60 = vmul.f32 %v159_v59, %v439_v23  ;;  %v178_v61 = vstv %s276_s21  ;;  %s282_s26 = sld [smem:[#allocation7 + $0x14]] }
  0x43   :  { %v157_v63 = vadd.f32 %v156_v58, %v153_v54  ;;  %v179_v2 = vmul.f32 %v178_v61, %v417_v0  ;;  %v181_v4 = vstv %s277_s22  ;;  %s283_s27 = sld [smem:[#allocation7 + $0x17]]  ;;  %vm116_vm0 = vcmp.eq.f32.partialorder %v449_v49, inf }
  0x44   :  { %v149_v62 = vmul.f32 %v148_v57, %v148_v57  ;;  %v182_v5 = vmul.f32 %v181_v4, %v419_v1  ;;  %v185_v7 = vstv %s278_s23  ;;  %s284_s28 = sld [smem:[#allocation7 + $0x1a]]  ;;  %vm118_vm1 = vcmp.eq.f32.partialorder %v449_v49, 0.0 }
  0x45   :  { %v161_v10 = vadd.f32 %v160_v60, %v157_v63  ;;  %v186_v11 = vmul.f32 %v185_v7, %v421_v3  ;;  %v190_v13 = vstv %s279_s24  ;;  %s58_s29 = sld [smem:[#allocation8]]  ;;  %v231_v63 = vstv %s479_s3 }
  0x46   :  { %v150_v8 = vadd.f32 %v149_v62, %v137_v56  ;;  %v183_v14 = vadd.f32 %v182_v5, %v179_v2  ;;  %v191_v15 = vmul.f32 %v190_v13, %v424_v6  ;;  %v193_v17 = vstv %s280_s25  ;;  %s265_s0 = sld [smem:[#allocation8 + $0x1]] }
  0x47   :  { %v162_v18 = vmul.f32 %v161_v10, %v161_v10  ;;  %v194_v20 = vmul.f32 %v193_v17, %v427_v9  ;;  %v197_v21 = vstv %s281_s1  ;;  %s275_s30 = sld [smem:[#allocation8 + $0x2]] }
  0x48   :  { %v187_v0 = vadd.f32 %v186_v11, %v183_v14  ;;  %v198_v22 = vmul.f32 %v197_v21, %v430_v12  ;;  %v203_v24 = vstv %s282_s26 }
  0x49   :  { %v163_v1 = vadd.f32 %v162_v18, %v150_v8  ;;  %v195_v25 = vadd.f32 %v194_v20, %v191_v15  ;;  %v204_v26 = vmul.f32 %v203_v24, %v433_v16  ;;  %v206_v27 = vstv %s283_s27 }
  0x4a   :  { %v207_v3 = vmul.f32 %v206_v27, %v436_v19  ;;  %v210_v28 = vstv %s284_s28  ;;  %v188_v29 = vmul.f32 %v187_v0, %v187_v0  ;;  %v119_v19 = vand.u32 2147483648, %v449_v49 }
  0x4b   :  { %293 = vrsqrt.f32 %v163_v1  ;;  %v199_v6 = vadd.f32 %v198_v22, %v195_v25  ;;  %v211_v31 = vmul.f32 %v210_v28, %v439_v23  ;;  %v121_v38 = vstv %s58_s29 }
  0x4c   :  { %v208_v30 = vadd.f32 %v207_v3, %v204_v26  ;;  %vm166_vm2 = vcmp.eq.f32.partialorder %v163_v1, inf  ;;  %v169_v39 = vand.u32 2147483648, %v163_v1  ;;  %vm168_vm3 = vcmp.eq.f32.partialorder %v163_v1, 0.0 }
  0x4d   :  { %v200_v32 = vmul.f32 %v199_v6, %v199_v6  ;;  %v171_v41 = vstv %s265_s0 }
  0x4e   :  { %v212_v33 = vadd.f32 %v211_v31, %v208_v30 }
  0x4f   :  { %v292_v9 = vpop.eup %291  ;;  %v201_v12 = vadd.f32 %v200_v32, %v188_v29 }
  0x50   :  { %v213_v34 = vmul.f32 %v212_v33, %v212_v33  ;;  %v115_v35 = vmul.f32 %v292_v9, %v449_v49 }
  0x52   :  { %v214_v16 = vadd.f32 %v213_v34, %v201_v12  ;;  %v117_v36 = vsel %vm116_vm0, %v449_v49, %v115_v35  ;;  %v222_v49 = vstv %s275_s30 }
  0x53   :  { %v120_v37 = vsel %vm118_vm1, %v119_v19, %v117_v36 }
  0x54   :  { %295 = vrsqrt.f32 %v214_v16  ;;  %v122_v42 = vsub.f32 %v121_v38, %v120_v37  ;;  %vm217_vm4 = vcmp.eq.f32.partialorder %v214_v16, inf  ;;  %v220_v50 = vand.u32 2147483648, %v214_v16 }
  0x55   :  { %vm219_vm5 = vcmp.eq.f32.partialorder %v214_v16, 0.0 }
  0x56   :  { %v123_v46 = vmul.f32 1.442695, %v122_v42 }
  0x58   :  { %v294_v23 = vpop.eup %293  ;;  %297 = vpow2.f32 %v123_v46 }
  0x59   :  { %v165_v40 = vmul.f32 %v294_v23, %v163_v1 }
  0x5b   :  { %v167_v43 = vsel %vm166_vm2, %v163_v1, %v165_v40 }
  0x5c   :  { %v170_v44 = vsel %vm168_vm3, %v169_v39, %v167_v43 }
  0x5d   :  { %v172_v45 = vsub.f32 %v171_v41, %v170_v44 }
  0x5f   :  { %v173_v47 = vmul.f32 1.442695, %v172_v45 }
  0x61   :  { %v296_v48 = vpop.eup %295  ;;  %299 = vpow2.f32 %v173_v47 }
  0x62   :  { %v216_v51 = vmul.f32 %v296_v48, %v214_v16 }
  0x64   :  { %v218_v52 = vsel %vm217_vm4, %v214_v16, %v216_v51 }
  0x65   :  { %v221_v53 = vsel %vm219_vm5, %v220_v50, %v218_v52  ;;  %v298_v56 = vpop.eup %297 }
  0x66   :  { %v223_v54 = vsub.f32 %v222_v49, %v221_v53 }
  0x68   :  { %v224_v55 = vmul.f32 1.442695, %v223_v54 }
  0x6a   :  { %301 = vpow2.f32 %v224_v55 }
  0x6e   :  { %v300_v57 = vpop.eup %299 }
  0x6f   :  { %v175_v58 = vadd.f32 %v300_v57, %v298_v56 }
  0x77   :  { %v302_v59 = vpop.eup %301 }
  0x78   :  { %v226_v60 = vadd.f32 %v302_v59, %v175_v58 }
  0x7a   :  { %v227_v61 = vadd.f32 1e-12, %v226_v60 }
  0x7c   :  { %303 = vlog2.f32 %v227_v61 }
  0x89   :  { %v304_v62 = vpop.eup %303 }
  0x8a   :  { %v229_v2 = vmul.f32 0.6931472, %v304_v62 }
  0x8c   :  { %v232_v4 = vsub.f32 %v229_v2, %v231_v63 }
  0x8e   :  { %v233_v5 = vrot.slane %v232_v4, 4 }
  0x90   :  { %v234_v7 = vadd.f32 %v233_v5, %v232_v4 }
  0x92   :  { %v235_v8 = vrot.slane %v234_v7, 2 }
  0x94   :  { %v236_v10 = vadd.f32 %v235_v8, %v234_v7 }
  0x96   :  { %v237_v11 = vrot.slane %v236_v10, 1 }
  0x98   :  { %v238_v13 = vadd.f32 %v237_v11, %v236_v10 }
  0x9a   :  { %239 = vst [vmem:[#allocation10] sm:$0x1] %v238_v13 }
  0x9b   :  { %360 = shalt.err (!%p357_p5)
}
  0x9c   :  { %249 = dma.vmem_to_hbm [thread:$0]  %s247_s7, 16, %s480_s4, [#allocation5]  }
  0x9d   :  { %375 = dma.done.wait [#allocation5], 16  }
  0x9e   :  { %376 = vsyncadd [#allocation5], 4294967280 }
  0x9f   :  { %253 = vsyncpa [#allocation4], 1 }
  0xa0   :  { %254 = vsyncpa [#allocation5], 1 }
  0xa1   :  { %255 = vsyncpa [#allocation6], 1 }
  0xa2   :  { %256 = vsyncpa [#allocation9], 1 }

</bundles_post_ra>
